<compile_context>
chip_gen: v5e
topology: v5e:2x2
jax: 0.10.0
libtpu: 0.0.40
codegen_flags: <defaults>
</compile_context>

<pallas_src>
import functools

import jax
import jax.numpy as jnp
from jax.experimental import pallas as pl
from jax.experimental.pallas import tpu as pltpu


def _round_up(x, m):
    return -(-x // m) * m


def _log_encoder_kernel(x_ref, o_ref, *, clip):
    # Compute in f32 so the clip constant and the log match the PyTorch f32
    # path even for bf16 payloads (the cast is a no-op for f32 inputs).
    x = x_ref[...].astype(jnp.float32)
    y = jnp.log(jnp.maximum(x, jnp.float32(clip)))   # VPU max + EUP log
    o_ref[...] = y.astype(o_ref.dtype)


def log_encoder_forward(payload, seq_lens, clip=1e-6):
    """Pallas implementation of LogEncoder.forward.

    Args:
      payload: (B, L) float array.
      seq_lens: (B,) int array (passed through, as in PaddedBatch).
      clip: lower clip value applied before the log.

    Returns:
      (payload_out, seq_lens) where payload_out has shape (B, L, 1).
    """
    if payload.ndim != 2:
        raise ValueError(f"Expected tensor with shape (B, L), got {payload.shape}.")
    B, L = payload.shape
    dtype = payload.dtype
    itemsize = jnp.dtype(dtype).itemsize

    LANE = 128
    MAX_COL = 2048                       # lane-width cap per block
    BLOCK_BUDGET = 4 * 1024 * 1024       # ~4 MiB/block; x4 with double-buffered in+out

    # dtype-aware sublane alignment: 8 (f32), 16 (bf16/f16), 32 (int8/fp8).
    sublane = max(8, (8 * 4) // itemsize)

    # Column (lane) tile: full dim if it fits in one lane-register row, else a
    # multiple of 128 with one masked boundary block.
    if L <= LANE:
        col_tile = L                      # equal-to-full-dim blocks are always legal
    else:
        col_tile = min(MAX_COL, _round_up(L, LANE))

    # Row (sublane) tile: as many sublane-aligned rows as fit the block budget.
    max_rows = max(sublane, (BLOCK_BUDGET // (col_tile * itemsize)) // sublane * sublane)
    row_tile = min(max_rows, _round_up(B, sublane))

    grid = (pl.cdiv(B, row_tile), pl.cdiv(L, col_tile))

    out2d = pl.pallas_call(
        functools.partial(_log_encoder_kernel, clip=float(clip)),
        out_shape=jax.ShapeDtypeStruct((B, L), dtype),
        grid=grid,
        in_specs=[pl.BlockSpec((row_tile, col_tile), lambda i, j: (i, j))],
        out_specs=pl.BlockSpec((row_tile, col_tile), lambda i, j: (i, j)),
        compiler_params=pltpu.CompilerParams(
            dimension_semantics=("parallel", "parallel"),
            vmem_limit_bytes=32 * 1024 * 1024,
        ),
    )(payload)

    # unsqueeze(-1): pure metadata reshape done outside the kernel (keeping the
    # kernel output (B, L) keeps stores lane-dense instead of 1-lane wide).
    return out2d[..., None], seq_lens


if __name__ == "__main__":
    key = jax.random.PRNGKey(0)
    k1, k2 = jax.random.split(key)

    # --- primary small shape, mix of positive / tiny / negative values -------
    B, L = 2, 128
    payload = jax.random.uniform(k1, (B, L), dtype=jnp.float32, minval=-0.5, maxval=2.0)
    seq_lens = jnp.array([L, L // 2], dtype=jnp.int32)

    out, lens = log_encoder_forward(payload, seq_lens, clip=1e-6)
    out = jax.block_until_ready(out)

    ref = jnp.log(jnp.maximum(payload, 1e-6))[..., None]
    assert out.shape == (B, L, 1), out.shape
    assert jnp.allclose(out, ref, atol=1e-6, rtol=1e-6), "mismatch vs reference"
    assert jnp.array_equal(lens, seq_lens)

    # --- unaligned shape: exercises masked boundary blocks (no pad/slice) ----
    B2, L2 = 3, 200
    payload2 = jax.random.uniform(k2, (B2, L2), dtype=jnp.float32, minval=-1.0, maxval=3.0)
    seq_lens2 = jnp.array([L2, 150, 10], dtype=jnp.int32)

    out2, lens2 = log_encoder_forward(payload2, seq_lens2)
    out2 = jax.block_until_ready(out2)

    ref2 = jnp.log(jnp.maximum(payload2, 1e-6))[..., None]
    assert out2.shape == (B2, L2, 1), out2.shape
    assert jnp.allclose(out2, ref2, atol=1e-6, rtol=1e-6), "mismatch vs reference (unaligned)"
    assert jnp.array_equal(lens2, seq_lens2)

    print("KERNEL_OK")
</pallas_src>

<mosaic_0001>
module attributes {stable_mosaic.version = 11 : i64} {
  func.func @_log_encoder_kernel(%arg0: i32, %arg1: i32, %arg2: memref<8x128xf32, #tpu.memory_space<vmem>>, %arg3: memref<8x128xf32, #tpu.memory_space<vmem>>) attributes {dimension_semantics = [#tpu.dimension_semantics<parallel>, #tpu.dimension_semantics<parallel>], iteration_bounds = array<i64: 1, 1>, scalar_prefetch = 0 : i64, scratch_operands = 0 : i64, tpu.core_type = #tpu.core_type<tc>, window_params = [{transform_indices = @transform_0, window_bounds = array<i64: 8, 128>}, {transform_indices = @transform_1, window_bounds = array<i64: 8, 128>}]} {
    %c0 = arith.constant 0 : index
    %c0_0 = arith.constant 0 : index
    %0 = vector.load %arg2[%c0, %c0_0] : memref<8x128xf32, #tpu.memory_space<vmem>>, vector<8x128xf32>
    %cst = arith.constant 9.99999997E-7 : f32
    %1 = vector.broadcast %cst : f32 to vector<8x128xf32>
    %2 = arith.maximumf %0, %1 : vector<8x128xf32>
    %3 = math.log %2 : vector<8x128xf32>
    %c0_1 = arith.constant 0 : index
    %c0_2 = arith.constant 0 : index
    %4 = vector.load %arg3[%c0_1, %c0_2] : memref<8x128xf32, #tpu.memory_space<vmem>>, vector<8x128xf32>
    tpu.vector_store %arg3[%c0_1, %c0_2], %3 {strides = array<i32>} : memref<8x128xf32, #tpu.memory_space<vmem>>, vector<8x128xf32>,
    return
  }
  func.func @transform_0(%arg0: i32, %arg1: i32) -> (i32, i32) {
    %c0_i32 = arith.constant 0 : i32
    return %arg0, %arg1 : i32, i32
  }
  func.func @transform_1(%arg0: i32, %arg1: i32) -> (i32, i32) {
    %c0_i32 = arith.constant 0 : i32
    return %arg0, %arg1 : i32, i32
  }
}

</mosaic_0001>

<bundles_post_ra>
// kernel: tpu_custom_call.1
= control target key start
LH: loop header
LB: loop body
LE: loop exit
PB: predicated region body
PF: predicated region fallthrough
CT: control target
= control target key end

     0   :  { %6 = vsyncpa [#allocation3], 0  ;;  %s127_s0 = inlined_call_operand.hbm [shape: f32[2,128], index: 0, kind: input, shape index: {}]   ;;  %s128_s1 = inlined_call_operand.hbm [shape: f32[2,128], index: 1, kind: output, shape index: {}]  }
   0x1   :  { %7 = vsyncpa [#allocation4], 0 }
   0x2   :  { %11 = vsyncadd [#allocation3], 96  ;;  %s12_s8 = sshll.u32 %s127_s0, 4  ;;  %s107_s9 = smov [#allocation2]   ;;  %s13_s8 = int_to_ptr.hbm [resolvable:$true] %s12_s8 }
   0x3   :  { %s14_s10 = sshll.u32 %s107_s9, 4  ;;  %s108_s11 = smov 32   ;;  %s15_s10 = int_to_ptr.vmem [resolvable:$true] %s14_s10 }
   0x4   :  { %s109_s12 = smov 2  }
   0x5   :  { %20 = dma.hbm_to_vmem [thread:$0]  %s13_s8, 32, %s15_s10, [#allocation3], %s108_s11, %s108_s11, %s109_s12  }
   0x6   :  { %103 = dma.done.wait [#allocation3], 128  }
   0x7   :  { %104 = vsyncadd [#allocation3], 4294967168  ;;  %v25_v0 = vld [vmem:[#allocation2] sm:$0xff] }
   0x8   :  { %v26_v1 = vmax.f32 %v25_v0, 1e-06 }
   0xa   :  { %53 = vlog2.f32 %v26_v1 }
  0x10   :  { %v54_v2 = vpop.eup %53 }
  0x11   :  { %v28_v3 = vmul.f32 0.6931472, %v54_v2 }
  0x13   :  { %29 = vst [vmem:[#allocation5] sm:$0xff] %v28_v3 }
  0x14   :  { %33 = vsyncadd [#allocation4], 96  ;;  %s36_s0 = sshll.u32 %s128_s1, 4  ;;  %s110_s15 = smov [#allocation5]   ;;  %s37_s0 = int_to_ptr.hbm [resolvable:$true] %s36_s0 }
  0x15   :  { %s34_s16 = sshll.u32 %s110_s15, 4  ;;  %s35_s16 = int_to_ptr.vmem [resolvable:$true] %s34_s16 }
  0x16   :  { %42 = dma.vmem_to_hbm [thread:$0]  %s35_s16, 32, %s37_s0, [#allocation4], %s108_s11, %s108_s11, %s109_s12  }
  0x17   :  { %105 = dma.done.wait [#allocation4], 128  }
  0x18   :  { %106 = vsyncadd [#allocation4], 4294967168 }
  0x19   :  { %47 = vsyncpa [#allocation3], 1 }
  0x1a   :  { %48 = vsyncpa [#allocation4], 1 }

</bundles_post_ra>
